<compile_context>
chip_gen: v7x
topology: tpu7x:2x2x1
jax: 0.10.0
libtpu: 0.0.40
codegen_flags: <defaults>
</compile_context>

<pallas_src>
import functools

import jax
import jax.numpy as jnp
from jax import lax
from jax.experimental import pallas as pl
from jax.experimental.pallas import tpu as pltpu

_NEG_BIG = -1e30  # finite "-inf" for padded vocab columns (avoids inf-inf NaNs)


def _round_up(x, m):
    return (x + m - 1) // m * m


def cbow_kernel(mean_ref, w_ref, b_ref, out_ref, m_sc, l_sc):
    """Grid = (B_tiles, 2 passes, V_tiles).

    Pass 0: compute the logits tile on the MXU and accumulate a running
            max / sum-exp per row into VMEM scratch (online softmax stats).
    Pass 1: recompute the logits tile and write log_softmax = logits - m - log(l).
    """
    p = pl.program_id(1)
    v = pl.program_id(2)

    # (b_tile, E) bf16 x (v_tile, E) bf16 contracted over E -> (b_tile, v_tile) f32.
    logits = lax.dot_general(
        mean_ref[...], w_ref[...],
        dimension_numbers=(((1,), (1,)), ((), ())),
        preferred_element_type=jnp.float32) + b_ref[...]

    @pl.when((p == 0) & (v == 0))
    def _init():
        m_sc[...] = jnp.full_like(m_sc, -jnp.inf)
        l_sc[...] = jnp.zeros_like(l_sc)

    @pl.when(p == 0)
    def _accumulate():
        m_prev = m_sc[...]
        m_new = jnp.maximum(m_prev, jnp.max(logits, axis=-1, keepdims=True))
        l_sc[...] = (l_sc[...] * jnp.exp(m_prev - m_new)
                     + jnp.sum(jnp.exp(logits - m_new), axis=-1, keepdims=True))
        m_sc[...] = m_new
        # Deterministic placeholder write; overwritten by pass 1 for this block.
        out_ref[...] = logits

    @pl.when(p == 1)
    def _finalize():
        out_ref[...] = logits - (m_sc[...] + jnp.log(l_sc[...]))


@functools.partial(jax.jit, static_argnames=("b_tile", "v_tile"))
def cbow_forward(indices, emb_table, weight, bias, *, b_tile=128, v_tile=512):
    """indices: (B, C) int32; emb_table: (V, E); weight: (V, E); bias: (V,)."""
    B, C = indices.shape
    V, E = emb_table.shape

    # Embedding gather fused with the context mean (XLA fuses the gather into
    # the reduction); the kernel only sees the (B, E) activation.
    # TODO(synk): pull the gather+mean into the kernel via scalar-prefetched
    # indices + manual DMA from an HBM-resident table to remove this step too.
    mean = jnp.mean(jnp.take(emb_table, indices, axis=0), axis=1)

    # Tile sizes: lane-dense V tiles (multiple of 128), sublane-aligned B tiles.
    b_tile = min(b_tile, _round_up(B, 8))
    v_tile = min(v_tile, _round_up(V, 128))
    B_pad = _round_up(B, b_tile)
    V_pad = _round_up(V, v_tile)
    n_b, n_v = B_pad // b_tile, V_pad // v_tile

    if B_pad != B:
        mean = jnp.pad(mean, ((0, B_pad - B), (0, 0)))
    if V_pad != V:
        weight = jnp.pad(weight, ((0, V_pad - V), (0, 0)))
        bias = jnp.pad(bias, (0, V_pad - V), constant_values=_NEG_BIG)

    # bf16 operands for the MXU; accumulation stays f32 inside the kernel.
    mean_bf = mean.astype(jnp.bfloat16)
    w_bf = weight.astype(jnp.bfloat16)            # (V_pad, E): no host transpose
    bias2 = bias.astype(jnp.float32).reshape(1, V_pad)

    # VMEM budget: double-buffered tiles + scratch, with headroom (v7x-safe).
    tile_bytes = (b_tile * E * 2 + v_tile * E * 2 + v_tile * 4
                  + b_tile * v_tile * 4)
    vmem_limit = int(min(48 * 1024 * 1024, max(8 * 1024 * 1024, 4 * tile_bytes)))

    out = pl.pallas_call(
        cbow_kernel,
        out_shape=jax.ShapeDtypeStruct((B_pad, V_pad), jnp.float32),
        grid_spec=pltpu.PrefetchScalarGridSpec(
            num_scalar_prefetch=0,
            grid=(n_b, 2, n_v),
            in_specs=[
                pl.BlockSpec((b_tile, E), lambda b, p, v: (b, 0)),
                pl.BlockSpec((v_tile, E), lambda b, p, v: (v, 0)),
                pl.BlockSpec((1, v_tile), lambda b, p, v: (0, v)),
            ],
            out_specs=pl.BlockSpec((b_tile, v_tile), lambda b, p, v: (b, v)),
            scratch_shapes=[pltpu.VMEM((b_tile, 1), jnp.float32),
                            pltpu.VMEM((b_tile, 1), jnp.float32)],
        ),
        compiler_params=pltpu.CompilerParams(
            dimension_semantics=("parallel", "arbitrary", "arbitrary"),
            vmem_limit_bytes=vmem_limit),
        cost_estimate=pl.CostEstimate(
            flops=4 * B_pad * E * V_pad,               # logits computed twice
            transcendentals=2 * B_pad * V_pad,
            bytes_accessed=(mean_bf.size * 2 + n_b * w_bf.size * 2
                            + bias2.size * 4 + B_pad * V_pad * 4)),
    )(mean_bf, w_bf, bias2)

    return out[:B, :V]


def cbow_reference(indices, emb_table, weight, bias):
    emb = jnp.take(emb_table, indices, axis=0)
    mean = jnp.sum(emb, axis=1) / emb.shape[1]
    logits = mean @ weight.T + bias
    return jax.nn.log_softmax(logits, axis=-1)


if __name__ == "__main__":
    # Small shapes consistent with CBOW(vocab_size, embedding_dim); vocab is
    # deliberately not a multiple of 128 and batch not a multiple of the tile
    # so the padding / masking and multi-V-tile log-softmax paths are exercised.
    vocab_size = 320
    embedding_dim = 64
    batch = 20
    context = 5

    key = jax.random.PRNGKey(0)
    k_emb, k_w, k_b, k_idx = jax.random.split(key, 4)

    emb_table = jax.random.normal(k_emb, (vocab_size, embedding_dim),
                                  dtype=jnp.float32)
    weight = jax.random.normal(k_w, (vocab_size, embedding_dim),
                               dtype=jnp.float32) * 0.1
    bias = jax.random.normal(k_b, (vocab_size,), dtype=jnp.float32) * 0.1
    indices = jax.random.randint(k_idx, (batch, context), 0, vocab_size,
                                 dtype=jnp.int32)

    out = cbow_forward(indices, emb_table, weight, bias, v_tile=128)
    out = jax.block_until_ready(out)

    ref = cbow_reference(indices, emb_table, weight, bias)
    assert out.shape == (batch, vocab_size)
    assert bool(jnp.isfinite(out).all())
    # bf16 MXU operands (f32 accumulate) -> loosened tolerance vs f32 reference.
    assert jnp.allclose(out, ref, atol=3e-2), float(jnp.max(jnp.abs(out - ref)))

    print("KERNEL_OK")
</pallas_src>

<mosaic_0001>
module attributes {stable_mosaic.version = 11 : i64} {
  func.func @cbow_kernel(%arg0: i32, %arg1: i32, %arg2: i32, %arg3: memref<24x64xbf16, #tpu.memory_space<vmem>>, %arg4: memref<128x64xbf16, #tpu.memory_space<vmem>>, %arg5: memref<1x128xf32, #tpu.memory_space<vmem>>, %arg6: memref<24x128xf32, #tpu.memory_space<vmem>>, %arg7: memref<24x1xf32, #tpu.memory_space<vmem>>, %arg8: memref<24x1xf32, #tpu.memory_space<vmem>>) attributes {dimension_semantics = [#tpu.dimension_semantics<parallel>, #tpu.dimension_semantics<arbitrary>, #tpu.dimension_semantics<arbitrary>], iteration_bounds = array<i64: 1, 2, 3>, scalar_prefetch = 0 : i64, scratch_operands = 2 : i64, tpu.core_type = #tpu.core_type<tc>, window_params = [{transform_indices = @transform_0, window_bounds = array<i64: 24, 64>}, {transform_indices = @transform_1, window_bounds = array<i64: 128, 64>}, {transform_indices = @transform_2, window_bounds = array<i64: 1, 128>}, {transform_indices = @transform_3, window_bounds = array<i64: 24, 128>}]} {
    %c0 = arith.constant 0 : index
    %c0_0 = arith.constant 0 : index
    %0 = vector.load %arg3[%c0, %c0_0] : memref<24x64xbf16, #tpu.memory_space<vmem>>, vector<24x64xbf16>
    %c0_1 = arith.constant 0 : index
    %c0_2 = arith.constant 0 : index
    %1 = vector.load %arg4[%c0_1, %c0_2] : memref<128x64xbf16, #tpu.memory_space<vmem>>, vector<128x64xbf16>
    %cst = arith.constant dense<0.000000e+00> : vector<24x128xf32>
    %2 = tpu.matmul %0, %1, %cst {dimension_numbers = #tpu.dot_dimension_numbers<[1], [1], [0], [0], [0, 0, 1, 0], [], []>} : vector<24x64xbf16>, vector<128x64xbf16>, vector<24x128xf32> -> vector<24x128xf32>
    %c0_3 = arith.constant 0 : index
    %c0_4 = arith.constant 0 : index
    %3 = vector.load %arg5[%c0_3, %c0_4] : memref<1x128xf32, #tpu.memory_space<vmem>>, vector<1x128xf32>
    %4 = vector.broadcast %3 : vector<1x128xf32> to vector<24x128xf32>
    %5 = arith.addf %2, %4 : vector<24x128xf32>
    %c0_i32 = arith.constant 0 : i32
    %6 = arith.cmpi eq, %arg1, %c0_i32 : i32
    %c0_i32_5 = arith.constant 0 : i32
    %7 = arith.cmpi eq, %arg2, %c0_i32_5 : i32
    %8 = arith.andi %6, %7 : i1
    %9 = arith.extui %8 : i1 to i32
    %c0_i32_6 = arith.constant 0 : i32
    %10 = arith.cmpi ne, %9, %c0_i32_6 : i32
    scf.if %10 {
      %cst_10 = arith.constant 0xFF800000 : f32
      %17 = vector.broadcast %cst_10 : f32 to vector<24x1xf32>
      %c0_11 = arith.constant 0 : index
      %c0_12 = arith.constant 0 : index
      %18 = vector.load %arg7[%c0_11, %c0_12] : memref<24x1xf32, #tpu.memory_space<vmem>>, vector<24x1xf32>
      tpu.vector_store %arg7[%c0_11, %c0_12], %17 {strides = array<i32>} : memref<24x1xf32, #tpu.memory_space<vmem>>, vector<24x1xf32>,
      %cst_13 = arith.constant 0.000000e+00 : f32
      %19 = vector.broadcast %cst_13 : f32 to vector<24x1xf32>
      %c0_14 = arith.constant 0 : index
      %c0_15 = arith.constant 0 : index
      %20 = vector.load %arg8[%c0_14, %c0_15] : memref<24x1xf32, #tpu.memory_space<vmem>>, vector<24x1xf32>
      tpu.vector_store %arg8[%c0_14, %c0_15], %19 {strides = array<i32>} : memref<24x1xf32, #tpu.memory_space<vmem>>, vector<24x1xf32>,
    } else {
    }
    %c0_i32_7 = arith.constant 0 : i32
    %11 = arith.cmpi eq, %arg1, %c0_i32_7 : i32
    %12 = arith.extui %11 : i1 to i32
    %c0_i32_8 = arith.constant 0 : i32
    %13 = arith.cmpi ne, %12, %c0_i32_8 : i32
    scf.if %13 {
      %c0_10 = arith.constant 0 : index
      %c0_11 = arith.constant 0 : index
      %17 = vector.load %arg7[%c0_10, %c0_11] : memref<24x1xf32, #tpu.memory_space<vmem>>, vector<24x1xf32>
      %cst_12 = arith.constant dense<0xFF800000> : vector<24xf32>
      %18 = vector.multi_reduction <maximumf>, %5, %cst_12 [1] : vector<24x128xf32> to vector<24xf32>
      %19 = vector.shape_cast %18 : vector<24xf32> to vector<24x1xf32>
      %20 = arith.maximumf %17, %19 : vector<24x1xf32>
      %c0_13 = arith.constant 0 : index
      %c0_14 = arith.constant 0 : index
      %21 = vector.load %arg8[%c0_13, %c0_14] : memref<24x1xf32, #tpu.memory_space<vmem>>, vector<24x1xf32>
      %22 = arith.subf %17, %20 : vector<24x1xf32>
      %23 = math.exp %22 : vector<24x1xf32>
      %24 = arith.mulf %21, %23 : vector<24x1xf32>
      %25 = vector.broadcast %20 : vector<24x1xf32> to vector<24x128xf32>
      %26 = arith.subf %5, %25 : vector<24x128xf32>
      %27 = math.exp %26 : vector<24x128xf32>
      %cst_15 = arith.constant dense<0.000000e+00> : vector<24xf32>
      %28 = vector.multi_reduction <add>, %27, %cst_15 [1] : vector<24x128xf32> to vector<24xf32>
      %29 = vector.shape_cast %28 : vector<24xf32> to vector<24x1xf32>
      %30 = arith.addf %24, %29 : vector<24x1xf32>
      %c0_16 = arith.constant 0 : index
      %c0_17 = arith.constant 0 : index
      %31 = vector.load %arg8[%c0_16, %c0_17] : memref<24x1xf32, #tpu.memory_space<vmem>>, vector<24x1xf32>
      tpu.vector_store %arg8[%c0_16, %c0_17], %30 {strides = array<i32>} : memref<24x1xf32, #tpu.memory_space<vmem>>, vector<24x1xf32>,
      %c0_18 = arith.constant 0 : index
      %c0_19 = arith.constant 0 : index
      %32 = vector.load %arg7[%c0_18, %c0_19] : memref<24x1xf32, #tpu.memory_space<vmem>>, vector<24x1xf32>
      tpu.vector_store %arg7[%c0_18, %c0_19], %20 {strides = array<i32>} : memref<24x1xf32, #tpu.memory_space<vmem>>, vector<24x1xf32>,
      %c0_20 = arith.constant 0 : index
      %c0_21 = arith.constant 0 : index
      %33 = vector.load %arg6[%c0_20, %c0_21] : memref<24x128xf32, #tpu.memory_space<vmem>>, vector<24x128xf32>
      tpu.vector_store %arg6[%c0_20, %c0_21], %5 {strides = array<i32>} : memref<24x128xf32, #tpu.memory_space<vmem>>, vector<24x128xf32>,
    } else {
    }
    %c1_i32 = arith.constant 1 : i32
    %14 = arith.cmpi eq, %arg1, %c1_i32 : i32
    %15 = arith.extui %14 : i1 to i32
    %c0_i32_9 = arith.constant 0 : i32
    %16 = arith.cmpi ne, %15, %c0_i32_9 : i32
    scf.if %16 {
      %c0_10 = arith.constant 0 : index
      %c0_11 = arith.constant 0 : index
      %17 = vector.load %arg7[%c0_10, %c0_11] : memref<24x1xf32, #tpu.memory_space<vmem>>, vector<24x1xf32>
      %c0_12 = arith.constant 0 : index
      %c0_13 = arith.constant 0 : index
      %18 = vector.load %arg8[%c0_12, %c0_13] : memref<24x1xf32, #tpu.memory_space<vmem>>, vector<24x1xf32>
      %19 = math.log %18 : vector<24x1xf32>
      %20 = arith.addf %17, %19 : vector<24x1xf32>
      %21 = vector.broadcast %20 : vector<24x1xf32> to vector<24x128xf32>
      %22 = arith.subf %5, %21 : vector<24x128xf32>
      %c0_14 = arith.constant 0 : index
      %c0_15 = arith.constant 0 : index
      %23 = vector.load %arg6[%c0_14, %c0_15] : memref<24x128xf32, #tpu.memory_space<vmem>>, vector<24x128xf32>
      tpu.vector_store %arg6[%c0_14, %c0_15], %22 {strides = array<i32>} : memref<24x128xf32, #tpu.memory_space<vmem>>, vector<24x128xf32>,
    } else {
    }
    return
  }
  func.func @transform_0(%arg0: i32, %arg1: i32, %arg2: i32) -> (i32, i32) {
    %c0_i32 = arith.constant 0 : i32
    %c0_i32_0 = arith.constant 0 : i32
    return %arg0, %c0_i32 : i32, i32
  }
  func.func @transform_1(%arg0: i32, %arg1: i32, %arg2: i32) -> (i32, i32) {
    %c0_i32 = arith.constant 0 : i32
    %c0_i32_0 = arith.constant 0 : i32
    return %arg2, %c0_i32 : i32, i32
  }
  func.func @transform_2(%arg0: i32, %arg1: i32, %arg2: i32) -> (i32, i32) {
    %c0_i32 = arith.constant 0 : i32
    %c0_i32_0 = arith.constant 0 : i32
    return %c0_i32, %arg2 : i32, i32
  }
  func.func @transform_3(%arg0: i32, %arg1: i32, %arg2: i32) -> (i32, i32) {
    %c0_i32 = arith.constant 0 : i32
    return %arg0, %arg2 : i32, i32
  }
}

</mosaic_0001>

<bundles_post_ra>
// kernel: cbow_forward.1
= control target key start
LH: loop header
LB: loop body
LE: loop exit
PB: predicated region body
PF: predicated region fallthrough
CT: control target
= control target key end

     0   :  { %8 = vsyncpa [#allocation5], 0  ;;  %s1133_s0 = inlined_call_operand.vmem [shape: bf16[24,64], index: 0, kind: input, shape index: {}]   ;;  %s1134_s1 = inlined_call_operand.vmem [shape: bf16[384,64], index: 1, kind: input, shape index: {}]   ;;  %s1135_s2 = inlined_call_operand.vmem [shape: f32[1,384], index: 2, kind: input, shape index: {}]   ;;  %s1136_s3 = inlined_call_operand.hbm [shape: f32[24,384], index: 3, kind: output, shape index: {}]  }
   0x1   :  { %10 = vsyncpa [#allocation5 + $0x1], 0  ;;  %s926_s12 = smov 0   ;;  %s928_s13 = smov 0  }
   0x2   :  { %s930_s14 = smov 0   ;;  %s932_s15 = smov 0  }
   0x3   :  { %s934_s16 = smov 0   ;;  %s936_s17 = smov 0  }
   0x4   :  { %s938_s18 = smov 0   ;;  %s940_s19 = smov 0  }
   0x5 LB: > { %s627_s20 = sadd.s32 4294967295, %s896_s19   ;;  %s628_s21 = sadd.s32 4294967294, %s896_s19   ;;  %s896_s19 = sphi %s940_s19, %s16_s19   ;;  %s892_s18 = sphi %s938_s18, %s1145_s18   ;;  %s888_s17 = sphi %s936_s17, %s1144_s17   ;;  %s884_s16 = sphi %s934_s16, %s1143_s16   ;;  %s880_s15 = sphi %s932_s15, %s1142_s15   ;;  %s876_s14 = sphi %s930_s14, %s1141_s14   ;;  %s872_s13 = sphi %s928_s13, %s1140_s13   ;;  %s868_s12 = sphi %s926_s12, %s1139_s12  }
   0x6   : > { %s28_s22 = sadd.s32 1, %s888_s17  ;;  %s31_s23 = sadd.s32 1, %s892_s18 }
   0x7   : > { %p29_p0 = scmp.ge.s32.totalorder %s28_s22, 3  ;;  %s122_s24 = sadd.s32 1, %s876_s14 }
   0x8   : > { %p132_p1 = scmp.ne.s32.totalorder %s876_s14, %s872_s13  ;;  %p133_p2 = scmp.eq.s32.totalorder %s627_s20, 5 }
   0x9   : > { %s1147_s22 = smov (%p29_p0, %s28_s22), 0  ;;  %s1149_s23 = smov (!%p29_p0, %s31_s23), %s892_s18 }
   0xa   : > { %s118_s25 = ssub.s32 %s888_s17, %s1147_s22  ;;  %p978_p3 = por %p133_p2, %p132_p1 }
   0xb   : > { %p33_p4 = scmp.ge.s32.totalorder %s1149_s23, 2  ;;  %p120_p5 = scmp.eq.s32.totalorder %s118_s25, 0 }
   0xc   : > { %p138_p6 = scmp.ne.s32.totalorder %s872_s13, %s868_s12  ;;  %p139_p7 = scmp.eq.s32.totalorder %s628_s21, 5 }
   0xd   : > { %s1151_s23 = smov (%p33_p4, %s1149_s23), 0  ;;  %p632_p9 = scmp.ge.s32.totalorder %s896_s19, 1 }
   0xe   : > { %s987_s27 = scalar_select %p120_p5, %s876_s14, %s122_s24  }
   0xf   : > { %p989_p8 = por %p139_p7, %p138_p6  ;;  %p181_p10 = scmp.lt.s32.totalorder %s896_s19, 7 }
  0x11   : > { %p182_p11 = pnand %p632_p9, %p181_p10 }
  0x12   : > { %s210_s29 = sand.u32 (!%p182_p11), 1, %s872_s13   ;;  %s633_s30 = sshll.u32 (!%p182_p11), %s880_s15, 4  ;;  %vm304_vm0 = vcmask (!%p182_p11), 523264   ;;  %v778_v0 = vld [vmem:[%s1133_s0] sm:$0xff] (!%p182_p11)   ;;  %v779_v17 = vld [vmem:[%s1133_s0 + $0x8] ss:$0 sps:$4 sm:$0xff] (!%p182_p11)  }
  0x13   : > { %185 = sbr.rel (%p182_p11) target bundleno = 928 (0x3a0), region = 32  ;;  %p220_p12 = scmp.lt.s32.totalorder (!%p182_p11), %s633_s30, 47  ;;  %679 = vmatprep.mubr.msk.bf16.mxu0 (!%p182_p11), %vm304_vm0, %v778_v0 }
  0x14   : > { %s1002_s6 = smul.u32 (!%p182_p11), 24, %s210_s29  ;;  %p383_p13 = scmp.eq.s32.totalorder (!%p182_p11), %s884_s16, 0 }
  0x15   : > { %p384_p0 = scmp.eq.s32.totalorder (!%p182_p11), %s880_s15, 0  ;;  %p225_p2 = scmp.lt.s32.totalorder (!%p182_p11), %s880_s15, 2 }
  0x16   : > { %s1042_s4 = scalar_lea.vmem (!%p182_p11), [#allocation4], %s1002_s6 }
  0x17   : > { %p385_p1 = pnand (!%p182_p11), %p384_p0, %p383_p13 }
  0x1a   : > { %s1153_s30 = smov (!%p220_p12, %s633_s30), 47  ;;  %vm389_vm1 = vcmask (!%p385_p1), 7168   ;;  %v898_v26 = vmov (!%p385_p1), -inf   ;;  %v899_v27 = vmov (!%p385_p1), 0.0  }
  0x1b   : > { %s634_s7 = sshll.u32 %s1153_s30, 2  ;;  %390 = vst.msk [vmem:[#allocation2] sm:$0xff] (!%p385_p1), %vm389_vm1, %v898_v26  ;;  %391 = vst.msk [vmem:[#allocation2 + $0x8] sm:$0xff] (!%p385_p1), %vm389_vm1, %v898_v26 }
  0x1c   : > { %s223_s10 = scalar_lea.vmem %s1134_s1, %s634_s7  ;;  %392 = vst.msk [vmem:[#allocation2 + $0x10] sm:$0xff] (!%p385_p1), %vm389_vm1, %v898_v26  ;;  %393 = vst.msk [vmem:[#allocation3] sm:$0xff] (!%p385_p1), %vm389_vm1, %v899_v27 }
  0x1d   : > { %v770_v1 = vld [vmem:[%s223_s10] sm:$0xff]   ;;  %v771_v2 = vld [vmem:[%s223_s10 + $0x8] sm:$0xff]   ;;  %v772_v5 = vld [vmem:[%s223_s10 + $0x10] sm:$0xff]   ;;  %s226_s21 = scalar_select %p225_p2, %s880_s15, 2 }
  0x1e   : > { %683 = vmatprep.subr.msk.bf16.mxu0 %vm304_vm0, %v770_v1  ;;  %v312_v3 = vsel %vm304_vm0, %v770_v1, 0  ;;  %v315_v4 = vsel %vm304_vm0, %v771_v2, 0  ;;  %v318_v6 = vsel %vm304_vm0, %v772_v5, 0  ;;  %v773_v7 = vld [vmem:[%s223_s10 + $0x18] sm:$0xff]   ;;  %v774_v9 = vld [vmem:[%s223_s10 + $0x20] sm:$0xff]   ;;  %v775_v11 = vld [vmem:[%s223_s10 + $0x28] sm:$0xff]  }
  0x1f   : > { %664 = vmatpush3.bf16.xpose.msra.mxu0 %v312_v3  ;;  %v321_v8 = vsel %vm304_vm0, %v773_v7, 0  ;;  %v324_v10 = vsel %vm304_vm0, %v774_v9, 0  ;;  %v327_v12 = vsel %vm304_vm0, %v775_v11, 0  ;;  %v776_v13 = vld [vmem:[%s223_s10 + $0x30] sm:$0xff]   ;;  %v777_v15 = vld [vmem:[%s223_s10 + $0x38] sm:$0xff]   ;;  %s227_s30 = scalar_lea.vmem %s1135_s2, %s226_s21  ;;  %394 = vst.msk [vmem:[#allocation3 + $0x8] sm:$0xff] (!%p385_p1), %vm389_vm1, %v899_v27 }
  0x20   : > { %684 = vmatprep.subr.msk.bf16.mxu0 %vm304_vm0, %v771_v2  ;;  %v330_v14 = vsel %vm304_vm0, %v776_v13, 0  ;;  %v333_v16 = vsel %vm304_vm0, %v777_v15, 0  ;;  %v635_v18 = vld [vmem:[%s227_s30] ss:$0 sm:$0xff]  ;;  %395 = vst.msk [vmem:[#allocation3 + $0x10] sm:$0xff] (!%p385_p1), %vm389_vm1, %v899_v27 }
  0x27   : > { %666 = vmatpush3.bf16.xpose.msra.mxu0 %v315_v4 }
  0x28   : > { %685 = vmatprep.subr.msk.bf16.mxu0 %vm304_vm0, %v772_v5 }
  0x2f   : > { %668 = vmatpush3.bf16.xpose.msra.mxu0 %v318_v6 }
  0x30   : > { %686 = vmatprep.subr.msk.bf16.mxu0 %vm304_vm0, %v773_v7 }
  0x37   : > { %670 = vmatpush3.bf16.xpose.msra.mxu0 %v321_v8 }
  0x38   : > { %687 = vmatprep.subr.msk.bf16.mxu0 %vm304_vm0, %v774_v9 }
  0x3f   : > { %672 = vmatpush3.bf16.xpose.msra.mxu0 %v324_v10 }
  0x40   : > { %688 = vmatprep.subr.msk.bf16.mxu0 %vm304_vm0, %v775_v11 }
  0x47   : > { %674 = vmatpush3.bf16.xpose.msra.mxu0 %v327_v12 }
  0x48   : > { %689 = vmatprep.subr.msk.bf16.mxu0 %vm304_vm0, %v776_v13 }
  0x4f   : > { %676 = vmatpush3.bf16.xpose.msra.mxu0 %v330_v14 }
  0x50   : > { %690 = vmatprep.subr.msk.bf16.mxu0 %vm304_vm0, %v777_v15 }
  0x57   : > { %678 = vmatpush3.bf16.xpose.msra.mxu0 %v333_v16 }
  0x5e   : > { %680 = vmatmul.mubr.msk.bf16.vlgmr.msra.gmra.mrb[0].mxu0 %vm304_vm0, %v779_v17 }
 0x12f   : > { %388 = sbr.rel (%p385_p1) target bundleno = 310 (0x136), region = 36 }
 0x131   : > { %v681_v19 = vpop.f32.mrb[0].mxu0 }
 0x132   : > { %v1035_v20 = vadd.f32 %v681_v19, %v635_v18  ;;  %v369_v21 = vpop.f32.mrb[1].mxu0 }
 0x133   : > { %v1037_v22 = vadd.f32 %v635_v18, %v369_v21  ;;  %v682_v23 = vpop.f32.mrb[2].mxu0 }
 0x134   : > { %v372_v24 = vpop.f32.mrb[3].mxu0 }
 0x135   : > { %v1039_v25 = vadd.f32 %v635_v18, %v372_v24 }
 0x136 PF: > { %p648_p4 = scmp.ne.s32.totalorder %s884_s16, 0 }
 0x137   : > { %402 = vmax.xlane.f32.xlu0 (!%p648_p4), %v1037_v22  ;;  %406 = vmax.xlane.f32.xlu1 (!%p648_p4), %v1035_v20  ;;  %466 = vst [vmem:[%s1042_s4] sm:$0xff] (!%p648_p4), %v1037_v22  ;;  %467 = vst [vmem:[%s1042_s4 + $0x8] sm:$0xff] (!%p648_p4), %v1039_v25  ;;  %v900_v28 = vmov (!%p648_p4), 0   ;;  %v399_v29 = vld [vmem:[#allocation2] sm:$0xff] (!%p648_p4)  ;;  %v401_v30 = vld [vmem:[#allocation2 + $0x10] sm:$0xff] (!%p648_p4)  ;;  %vm459_vm2 = vcmask (!%p648_p4), 7168  }
 0x138   : > { %398 = sbr.rel (%p648_p4) target bundleno = 748 (0x2ec), region = 40  ;;  %468 = vst [vmem:[%s1042_s4 + $0x10] sm:$0xff] (!%p648_p4), %v1035_v20  ;;  %780 = vset.pattern.permute.xlu1 (!%p648_p4), %v900_v28  ;;  %781 = vset.pattern.permute.xlu0 (!%p648_p4), %v900_v28  ;;  %v400_v35 = vld [vmem:[#allocation2 + $0x8] sm:$0xff] (!%p648_p4)  ;;  %v411_v57 = vld [vmem:[#allocation3] sm:$0xff] (!%p648_p4)  ;;  %v412_v61 = vld [vmem:[#allocation3 + $0x8] sm:$0xff] (!%p648_p4) }
 0x139   : > { %v413_v0 = vld [vmem:[#allocation3 + $0x10] sm:$0xff] (!%p648_p4) }
 0x13b   : > { %404 = vmax.xlane.f32.xlu0 (!%p648_p4), %v1039_v25 }
 0x1c4   : > { %v403_v31 = vpop.xlane.xlu0 %402  ;;  %v407_v32 = vpop.xlane.xlu1 %406 }
 0x1c5   : > { %v408_v33 = vmax.f32 %v399_v29, %v403_v31  ;;  %v410_v34 = vmax.f32 %v401_v30, %v407_v32 }
 0x1c7   : > { %v414_v36 = vsub.f32 %v399_v29, %v408_v33  ;;  %463 = vst.msk [vmem:[#allocation2] sm:$0xff] %vm459_vm2, %v408_v33  ;;  %428 = vperm.xlu1 %780, %v408_v33   ;;  %v416_v37 = vsub.f32 %v401_v30, %v410_v34  ;;  %465 = vst.msk [vmem:[#allocation2 + $0x10] sm:$0xff] %vm459_vm2, %v410_v34 }
 0x1c8   : > { %v405_v38 = vpop.xlane.xlu0 %404 }
 0x1c9   : > { %v409_v39 = vmax.f32 %v400_v35, %v405_v38  ;;  %v417_v53 = vmul.f32 1.442695, %v414_v36  ;;  %v421_v55 = vmul.f32 1.442695, %v416_v37 }
 0x1cb   : > { %v415_v40 = vsub.f32 %v400_v35, %v409_v39  ;;  %464 = vst.msk [vmem:[#allocation2 + $0x8] sm:$0xff] %vm459_vm2, %v409_v39  ;;  %433 = vperm.xlu0 %781, %v409_v39   ;;  %438 = vperm.xlu1 %780, %v410_v34  }
 0x1cd   : > { %v419_v54 = vmul.f32 1.442695, %v415_v40 }
 0x246   : > { %v429_v41 = vpop.permute.xlu1 %428 }
 0x247   : > { %v441_v42 = vsub.f32 %v1037_v22, %v429_v41 }
 0x249   : > { %v444_v43 = vmul.f32 1.442695, %v441_v42 }
 0x24a   : > { %v434_v44 = vpop.permute.xlu0 %433  ;;  %v439_v45 = vpop.permute.xlu1 %438 }
 0x24b   : > { %782 = vpow2.f32 %v444_v43  ;;  %v442_v46 = vsub.f32 %v1039_v25, %v434_v44  ;;  %v443_v47 = vsub.f32 %v1035_v20, %v439_v45 }
 0x24d   : > { %v446_v48 = vmul.f32 1.442695, %v442_v46  ;;  %v448_v49 = vmul.f32 1.442695, %v443_v47 }
 0x24f   : > { %784 = vpow2.f32 %v446_v48 }
 0x250   : > { %786 = vpow2.f32 %v448_v49 }
 0x251   : > { %788 = vpow2.f32 %v417_v53 }
 0x252   : > { %790 = vpow2.f32 %v419_v54 }
 0x253   : > { %792 = vpow2.f32 %v421_v55 }
 0x255   : > { %v783_v50 = vpop.eup %782 }
 0x256   : > { %450 = vadd.xlane.f32.xlu1 %v783_v50 }
 0x259   : > { %v785_v51 = vpop.eup %784 }
 0x25a   : > { %v787_v52 = vpop.eup %786  ;;  %452 = vadd.xlane.f32.xlu0 %v785_v51 }
 0x25b   : > { %454 = vadd.xlane.f32.xlu1 %v787_v52  ;;  %v789_v56 = vpop.eup %788 }
 0x25c   : > { %v423_v58 = vmul.f32 %v789_v56, %v411_v57  ;;  %v791_v59 = vpop.eup %790 }
 0x25d   : > { %v793_v62 = vpop.eup %792  ;;  %v424_v1 = vmul.f32 %v791_v59, %v412_v61 }
 0x25e   : > { %v425_v3 = vmul.f32 %v793_v62, %v413_v0 }
 0x2e3   : > { %v451_v60 = vpop.xlane.xlu1 %450 }
 0x2e4   : > { %v456_v63 = vadd.f32 %v451_v60, %v423_v58 }
 0x2e6   : > { %460 = vst.msk [vmem:[#allocation3] sm:$0xff] %vm459_vm2, %v456_v63 }
 0x2e7   : > { %v453_v2 = vpop.xlane.xlu0 %452 }
 0x2e8   : > { %v457_v4 = vadd.f32 %v453_v2, %v424_v1  ;;  %v455_v5 = vpop.xlane.xlu1 %454 }
 0x2e9   : > { %v458_v6 = vadd.f32 %v455_v5, %v425_v3 }
 0x2ea   : > { %461 = vst.msk [vmem:[#allocation3 + $0x8] sm:$0xff] %vm459_vm2, %v457_v4 }
 0x2eb   : > { %462 = vst.msk [vmem:[#allocation3 + $0x10] sm:$0xff] %vm459_vm2, %v458_v6 }
 0x2ec PF: > { %p649_p5 = scmp.ne.s32.totalorder %s884_s16, 1 }
 0x2ed   : > { %v476_v7 = vld [vmem:[#allocation3] sm:$0xff] (!%p649_p5)  ;;  %v901_v8 = vmov (!%p649_p5), 0   ;;  %v473_v12 = vld [vmem:[#allocation2] sm:$0xff] (!%p649_p5)  ;;  %v475_v15 = vld [vmem:[#allocation2 + $0x10] sm:$0xff] (!%p649_p5) }
 0x2ee   : > { %472 = sbr.rel (%p649_p5) target bundleno = 902 (0x386), region = 44  ;;  %794 = vset.pattern.permute.xlu0 (!%p649_p5), %v901_v8  ;;  %796 = vlog2.f32 (!%p649_p5), %v476_v7  ;;  %795 = vset.pattern.permute.xlu1 (!%p649_p5), %v901_v8  ;;  %v474_v18 = vld [vmem:[#allocation2 + $0x8] sm:$0xff] (!%p649_p5) }
 0x2f1   : > { %v477_v10 = vld [vmem:[#allocation3 + $0x8] sm:$0xff] (!%p649_p5) }
 0x2f2   : > { %v478_v9 = vld [vmem:[#allocation3 + $0x10] sm:$0xff] (!%p649_p5) }
 0x2f3   : > { %798 = vlog2.f32 (!%p649_p5), %v478_v9 }
 0x2f4   : > { %800 = vlog2.f32 (!%p649_p5), %v477_v10 }
 0x2f8   : > { %v797_v11 = vpop.eup %796 }
 0x2f9   : > { %v480_v14 = vmul.f32 0.6931472, %v797_v11 }
 0x2fb   : > { %v485_v19 = vadd.f32 %v480_v14, %v473_v12 }
 0x2fd   : > { %v799_v13 = vpop.eup %798  ;;  %490 = vperm.xlu0 %794, %v485_v19  }
 0x2fe   : > { %v801_v16 = vpop.eup %800  ;;  %v484_v17 = vmul.f32 0.6931472, %v799_v13 }
 0x2ff   : > { %v482_v21 = vmul.f32 0.6931472, %v801_v16 }
 0x300   : > { %v487_v23 = vadd.f32 %v484_v17, %v475_v15 }
 0x301   : > { %v486_v24 = vadd.f32 %v482_v21, %v474_v18 }
 0x302   : > { %500 = vperm.xlu1 %795, %v487_v23  }
 0x303   : > { %495 = vperm.xlu0 %794, %v486_v24  }
 0x37c   : > { %v491_v26 = vpop.permute.xlu0 %490 }
 0x37d   : > { %v503_v27 = vsub.f32 %v1037_v22, %v491_v26 }
 0x37f   : > { %506 = vst [vmem:[%s1042_s4] sm:$0xff] %v503_v27 }
 0x381   : > { %v501_v28 = vpop.permute.xlu1 %500 }
 0x382   : > { %v505_v29 = vsub.f32 %v1035_v20, %v501_v28  ;;  %v496_v30 = vpop.permute.xlu0 %495 }
 0x383   : > { %v504_v31 = vsub.f32 %v1039_v25, %v496_v30 }
 0x384   : > { %508 = vst [vmem:[%s1042_s4 + $0x10] sm:$0xff] %v505_v29 }
 0x385   : > { %507 = vst [vmem:[%s1042_s4 + $0x8] sm:$0xff] %v504_v31 }
 0x386 PF: > { %s650_s16 = sshll.u32 %s880_s15, 7  ;;  %s525_s8 = sshll.u32 %s1042_s4, 4  ;;  %s1077_s8 = int_to_ptr.vmem [resolvable:$true] %s525_s8 }
 0x387   : > { %s1074_s7 = scalar_lea.hbm %s1136_s3, %s650_s16  ;;  %s1081_s9 = scalar_lea.sflag [#allocation5], %s210_s29 }
 0x388   : > { %s802_s10 = scalar_lea.vmem %s1077_s8, 384  ;;  %s902_s15 = smov [#allocation4]  }
 0x389   : > { %p803_p6 = scmp.ne.s32.totalorder %s1077_s8, %s802_s10  ;;  %s806_s11 = sshll.u32 %s902_s15, 4  ;;  %s807_s11 = int_to_ptr.vmem [resolvable:$false] %s806_s11 }
 0x38a   : > { %s808_s20 = scalar_lea.vmem %s807_s11, 768  ;;  %p809_p10 = scmp.lt.s32.totalorder %s1077_s8, %s807_s11 }
 0x38b   : > { %p804_p7 = pnand %p803_p6, %p978_p3  ;;  %p810_p11 = scmp.lt.s32.totalorder %s808_s20, %s802_s10 }
 0x38d   : > { %p805_p9 = pneg %p804_p7  ;;  %p811_p12 = por %p810_p11, %p809_p10 }
 0x38f   : > { %p812_p13 = pnand %p811_p12, %p805_p9 }
 0x391   : > { %815 = shalt.err (!%p812_p13)
}
 0x392   : > { %s816_s29 = scalar_lea.hbm %s1074_s7, 384  ;;  %s820_s25 = scalar_lea.hbm %s1136_s3, 1152 }
 0x393   : > { %p817_p0 = scmp.ne.s32.totalorder %s1074_s7, %s816_s29  ;;  %p821_p4 = scmp.lt.u32.totalorder %s1074_s7, %s1136_s3 }
 0x394   : > { %p822_p5 = scmp.lt.u32.totalorder %s820_s25, %s816_s29  ;;  %p824_p7 = scmp.lt.u32.totalorder %s816_s29, %s1074_s7 }
 0x395   : > { %p818_p1 = pnand %p817_p0, %p978_p3 }
 0x396   : > { %p823_p6 = por %p822_p5, %p821_p4 }
 0x397   : > { %p819_p2 = pneg %p818_p1 }
 0x398   : > { %p825_p9 = por %p824_p7, %p823_p6 }
 0x39a   : > { %p826_p10 = pnand %p825_p9, %p819_p2 }
 0x39c   : > { %829 = shalt.err (!%p826_p10)
}
 0x39d   : > { %s903_s16 = smov 128   ;;  %s904_s5 = smov 384  }
 0x39e   : > { %s905_s6 = smov 8  }
 0x39f   : > { %692 = dma.vmem_to_hbm [thread:$0]  (%p978_p3), %s1077_s8, 384, %s1074_s7, %s1081_s9, %s903_s16, %s904_s5, %s905_s6  }
 0x3a0 PF: > { %p698_p11 = scmp.ge.s32.totalorder %s896_s19, 2  ;;  %s540_s10 = sand.u32 1, %s868_s12  }
 0x3a1   : > { %s541_s15 = scalar_lea.sflag [#allocation5], %s540_s10 }
 0x3a2   : > { %p695_p12 = pnand %p698_p11, %p989_p8 }
 0x3a4   : > { %863 = dma.done.wait (!%p695_p12), %s541_s15, 384  }
 0x3a5   : > { %865 = vsyncadd (!%p695_p12), %s541_s15, 4294966912  ;;  %s16_s19 = sadd.s32 1, %s896_s19   ;;  %s1139_s12 = smov %s872_s13 }
 0x3a6   : > { %p13_p13 = scmp.ge.s32.totalorder %s16_s19, 8   ;;  %s1140_s13 = smov %s876_s14 }
 0x3a7   : > { %s1141_s14 = smov %s987_s27  ;;  %s1142_s15 = smov %s888_s17 }
 0x3a8   : > { %s1143_s16 = smov %s892_s18  ;;  %s1144_s17 = smov %s1147_s22 }
 0x3a9   : > { %s1145_s18 = smov %s1151_s23  ;;  %15 = sbr.rel (!%p13_p13) target bundleno = 5 (0x5), region = 85 }
 0x3b0   :  { %546 = vsyncpa [#allocation5], 1 }
 0x3b1   :  { %548 = vsyncpa [#allocation5 + $0x1], 1 }

</bundles_post_ra>
